<compile_context>
chip_gen: v6e
topology: v6e:2x2x1
jax: 0.10.0
libtpu: 0.0.40
codegen_flags: <defaults>
</compile_context>

<pallas_src>
from typing import NamedTuple

import jax
import jax.numpy as jnp
from jax import lax
from jax.experimental import pallas as pl
from jax.experimental.pallas import tpu as pltpu

_MIN_NORM = 1e-15
_ARTANH_EPS = 1e-5
_VMEM_LIMIT = 48 * 1024 * 1024  # fits v7x (64 MiB physical) with headroom


def _round_up(x, m):
    return (x + m - 1) // m * m


# ---------------------------------------------------------------------------
# Poincare ball (c = 1.0) math, shared by the rowwise kernels and the fused
# avg_mm epilogue.
# ---------------------------------------------------------------------------
def _row_norm(x):
    return jnp.maximum(jnp.sqrt(jnp.sum(x * x, axis=-1, keepdims=True)), _MIN_NORM)


def _expmap0_math(x):
    n = _row_norm(x)
    return jnp.tanh(n) * x / n


def _logmap0_math(x):
    n = _row_norm(x)
    z = jnp.clip(n, -1.0 + _ARTANH_EPS, 1.0 - _ARTANH_EPS)
    artanh = 0.5 * jnp.log((1.0 + z) / (1.0 - z))
    return artanh / n * x


def _expmap0_kernel(x_ref, o_ref):
    o_ref[...] = _expmap0_math(x_ref[...].astype(jnp.float32)).astype(o_ref.dtype)


def _logmap0_kernel(x_ref, o_ref):
    o_ref[...] = _logmap0_math(x_ref[...].astype(jnp.float32)).astype(o_ref.dtype)


def _rowwise(kernel, x, *, tm=512):
    n, h = x.shape
    tm = min(tm, _round_up(n, 8))
    n_pad = _round_up(n, tm)
    xp = jnp.pad(x.astype(jnp.float32), ((0, n_pad - n), (0, 0)))
    out = pl.pallas_call(
        kernel,
        out_shape=jax.ShapeDtypeStruct((n_pad, h), jnp.float32),
        grid_spec=pltpu.PrefetchScalarGridSpec(
            num_scalar_prefetch=0,
            grid=(n_pad // tm,),
            in_specs=[pl.BlockSpec((tm, h), lambda i: (i, 0))],
            out_specs=pl.BlockSpec((tm, h), lambda i: (i, 0)),
        ),
        compiler_params=pltpu.CompilerParams(
            dimension_semantics=("parallel",),
            vmem_limit_bytes=_VMEM_LIMIT),
    )(xp)
    return out[:n]


def expmap0(x):
    return _rowwise(_expmap0_kernel, x)


def logmap0(x):
    return _rowwise(_logmap0_kernel, x)


# ---------------------------------------------------------------------------
# avg / avg_r kernel:  row-softmax(ones adjacency) @ emb  ==  (mask @ emb)/deg
# ---------------------------------------------------------------------------
class PreparedAdj(NamedTuple):
    mask: jax.Array       # (Np, Mp) bf16 0/1, padded
    inv_deg: jax.Array    # (Np, 1)  f32, 1/max(deg, 1)
    blk_nz: jax.Array     # (Np//tm * Mp//tk,) int32: block has any nonzero
    blk_prev: jax.Array   # same shape: col-block index to fetch (DMA skip)
    n_rows: int
    n_cols: int
    tm: int
    tk: int


def prepare_adj(indices, n_rows, n_cols, *, tm=256, tk=512):
    """COO (2, E) indices -> dense 0/1 mask + 1/deg + block-skip tables.

    Built ONCE per graph (hoisted out of the forward) and reused by every
    avg_mm call that shares this adjacency.
    """
    mask = jnp.zeros((n_rows, n_cols), jnp.float32)
    mask = mask.at[indices[0], indices[1]].set(1.0)
    deg = jnp.sum(mask, axis=1, keepdims=True)
    inv_deg = 1.0 / jnp.maximum(deg, 1.0)        # empty rows stay 0 (acc == 0)

    tm = min(tm, _round_up(n_rows, 8))
    tk = min(tk, _round_up(n_cols, 128))
    n_pad = _round_up(n_rows, tm)
    m_pad = _round_up(n_cols, tk)
    mask_p = jnp.pad(mask, ((0, n_pad - n_rows), (0, m_pad - n_cols)))
    inv_p = jnp.pad(inv_deg, ((0, n_pad - n_rows), (0, 0)))

    n_i, n_k = n_pad // tm, m_pad // tk
    blk_sum = mask_p.reshape(n_i, tm, n_k, tk).sum(axis=(1, 3))
    blk_nz = (blk_sum > 0).astype(jnp.int32)
    cand = jnp.where(blk_nz > 0,
                     jnp.arange(n_k, dtype=jnp.int32)[None, :],
                     jnp.full((n_i, n_k), -1, jnp.int32))
    blk_prev = jnp.maximum(lax.cummax(cand, axis=1), 0).astype(jnp.int32)

    return PreparedAdj(mask_p.astype(jnp.bfloat16), inv_p.astype(jnp.float32),
                       blk_nz.reshape(-1), blk_prev.reshape(-1),
                       n_rows, n_cols, tm, tk)


def _make_avg_kernel(tk, n_k, epilogue):
    def kernel(nz_ref, prev_ref, a_ref, e_ref, d_ref, o_ref):
        del prev_ref  # only consumed by the mask index_map (DMA skipping)
        i = pl.program_id(0)
        k = pl.program_id(1)

        @pl.when(k == 0)
        def _():
            o_ref[...] = jnp.zeros_like(o_ref)

        @pl.when(nz_ref[i * n_k + k] > 0)        # skip all-zero mask tiles
        def _():
            start = pl.multiple_of(k * tk, tk)
            e_blk = e_ref[pl.ds(start, tk), :]   # slice of resident embedding
            o_ref[...] += jnp.dot(a_ref[...], e_blk,
                                  preferred_element_type=jnp.float32)

        @pl.when(k == pl.num_programs(1) - 1)
        def _():
            y = o_ref[...] * d_ref[...]          # row softmax == 1/deg scale
            if epilogue is not None:
                y = epilogue(y)
            o_ref[...] = y

    return kernel


def avg_mm(prep: PreparedAdj, emb, *, epilogue=None):
    """torch.sparse.mm(torch.sparse.softmax(ones-adj, dim=1), emb)."""
    n_pad, m_pad = prep.mask.shape
    tm, tk = prep.tm, prep.tk
    m, h = emb.shape
    assert m == prep.n_cols
    emb_p = jnp.pad(emb.astype(jnp.float32),
                    ((0, m_pad - m), (0, 0))).astype(jnp.bfloat16)
    n_i, n_k = n_pad // tm, m_pad // tk

    out = pl.pallas_call(
        _make_avg_kernel(tk, n_k, epilogue),
        out_shape=jax.ShapeDtypeStruct((n_pad, h), jnp.float32),
        grid_spec=pltpu.PrefetchScalarGridSpec(
            num_scalar_prefetch=2,
            grid=(n_i, n_k),
            in_specs=[
                # Mask tile; for all-zero blocks the index_map re-points at the
                # last nonzero block so the DMA is skipped entirely.
                pl.BlockSpec((tm, tk),
                             lambda i, k, nz, prev: (i, prev[i * n_k + k])),
                # Embedding: single VMEM-resident block, sliced in-kernel.
                pl.BlockSpec((m_pad, h), lambda i, k, nz, prev: (0, 0)),
                # Precomputed per-row 1/deg.
                pl.BlockSpec((tm, 1), lambda i, k, nz, prev: (i, 0)),
            ],
            out_specs=pl.BlockSpec((tm, h), lambda i, k, nz, prev: (i, 0)),
        ),
        compiler_params=pltpu.CompilerParams(
            dimension_semantics=("parallel", "arbitrary"),
            vmem_limit_bytes=_VMEM_LIMIT),
    )(prep.blk_nz, prep.blk_prev, prep.mask, emb_p, prep.inv_deg)
    return out[:prep.n_rows]


# ---------------------------------------------------------------------------
# Module glue (plain JAX): params, graph preparation (hoisted), forward
# ---------------------------------------------------------------------------
def xavier_uniform(key, shape):
    fan_in, fan_out = shape[1], shape[0]
    bound = (6.0 / (fan_in + fan_out)) ** 0.5
    return jax.random.uniform(key, shape, jnp.float32, -bound, bound)


def prepare_graph(ent_adj, rel_adj, adj_list, node_size, rel_size):
    """Densify + precompute 1/deg and block-skip tables ONCE per graph."""
    return {
        "ent": prepare_adj(ent_adj, node_size, node_size),
        "rel": prepare_adj(rel_adj, node_size, rel_size),
        "tri": prepare_adj(adj_list[:2], node_size, node_size),
    }


def nr_graph_attention_fused(features, tri_prep, depth):
    # TODO(synk): NR_GraphAttention is not included in the provided source;
    # stand-in concatenates [x, agg^1(x), ..., agg^depth(x)].  All features
    # share tri_adj, so they are aggregated jointly (one wider matmul per
    # depth step, one mask read) and split back afterwards.
    widths = [f.shape[1] for f in features]
    h = jnp.concatenate(features, axis=-1)
    levels = [h]
    for _ in range(depth):
        h = avg_mm(tri_prep, h)
        levels.append(h)
    outs, off = [], 0
    for w in widths:
        outs.append(jnp.concatenate([lv[:, off:off + w] for lv in levels],
                                    axis=-1))
        off += w
    return outs


def hyper_encode(x, ent_prep):
    # PoincareBall.proj_tan0 is the identity; expmap0/logmap0 exact for c=1.0.
    # TODO(synk): HyperbolicGraphConvolution / hyper_util are not included in
    # the provided source; stand-in per layer (2 layers, dims [128,128,128]):
    # logmap0 -> adjacency aggregation -> relu -> expmap0, with relu+expmap0
    # fused into the avg_mm epilogue (intermediates never round-trip HBM).
    fused_relu_expmap0 = lambda y: _expmap0_math(jnp.maximum(y, 0.0))
    h = expmap0(x)
    for _ in range(2):
        t = logmap0(h)
        h = avg_mm(ent_prep, t, epilogue=fused_relu_expmap0)
    return logmap0(h)


def st_encoder_forward(params, ent_adj, rel_adj, node_size, rel_size,
                       adj_list, r_index, r_val, triple_size, mask=None,
                       depth=2, graph=None):
    del r_index, r_val, triple_size, mask   # unused by the stand-in encoders
    if graph is None:  # prefer building once outside and passing it in
        graph = prepare_graph(ent_adj, rel_adj, adj_list, node_size, rel_size)

    ent_emb = params["ent_embedding"]       # (node_size, H)
    rel_emb = params["rel_embedding"]       # (rel_size, H)

    # avg / avg_r (sparse softmax + sparse mm) -> Pallas aggregation kernel
    ent_feature = avg_mm(graph["ent"], ent_emb)      # (N, H)
    rel_feature = avg_mm(graph["rel"], rel_emb)      # (N, H)

    ent_feat, rel_feat = nr_graph_attention_fused(
        [ent_feature, rel_feature], graph["tri"], depth)   # (N, 3H) each

    out_feature = jnp.concatenate([ent_feat, rel_feat], axis=-1)   # (N, 6H)
    # dropout_rate = 0.0 -> identity

    hyper_ent = ent_emb + hyper_encode(ent_emb, graph["ent"])      # (N, H)
    hyper_out_feature = jnp.concatenate(
        [hyper_ent, hyper_ent, hyper_ent, rel_feat], axis=-1)      # (N, 6H)

    return [out_feature, hyper_out_feature]


if __name__ == "__main__":
    key = jax.random.PRNGKey(0)
    node_size, rel_size = 256, 128
    node_hidden = rel_hidden = 128
    n_ent_edges, n_rel_edges, n_triples = 1024, 512, 1024

    ks = jax.random.split(key, 9)
    params = {
        "ent_embedding": xavier_uniform(ks[0], (node_size, node_hidden)),
        "rel_embedding": xavier_uniform(ks[1], (rel_size, rel_hidden)),
    }
    ent_adj = jnp.stack([
        jax.random.randint(ks[2], (n_ent_edges,), 0, node_size),
        jax.random.randint(ks[3], (n_ent_edges,), 0, node_size)])
    rel_adj = jnp.stack([
        jax.random.randint(ks[4], (n_rel_edges,), 0, node_size),
        jax.random.randint(ks[5], (n_rel_edges,), 0, rel_size)])
    adj_list = jnp.stack([
        jax.random.randint(ks[6], (n_triples,), 0, node_size),
        jax.random.randint(ks[7], (n_triples,), 0, node_size)])
    r_index = jax.random.randint(ks[8], (n_triples,), 0, rel_size)
    r_val = jnp.ones((n_triples,), jnp.float32)

    # Masks / degrees / block-skip tables built once, reused every forward.
    graph = prepare_graph(ent_adj, rel_adj, adj_list, node_size, rel_size)

    out_feature, hyper_out_feature = st_encoder_forward(
        params, ent_adj, rel_adj, node_size, rel_size,
        adj_list, r_index, r_val, n_triples, mask=None, depth=2, graph=graph)

    jax.block_until_ready((out_feature, hyper_out_feature))
    assert out_feature.shape == (node_size, 6 * node_hidden)
    assert hyper_out_feature.shape == (node_size, 6 * node_hidden)
    assert bool(jnp.all(jnp.isfinite(out_feature)))
    assert bool(jnp.all(jnp.isfinite(hyper_out_feature)))
    print("KERNEL_OK")
</pallas_src>

<mosaic_0001>
module attributes {stable_mosaic.version = 11 : i64} {
  func.func @kernel(%arg0: i32, %arg1: i32, %arg2: memref<1xi32, #tpu.memory_space<smem>>, %arg3: memref<1xi32, #tpu.memory_space<smem>>, %arg4: memref<256x256xbf16, #tpu.memory_space<vmem>>, %arg5: memref<256x128xbf16, #tpu.memory_space<vmem>>, %arg6: memref<256x1xf32, #tpu.memory_space<vmem>>, %arg7: memref<256x128xf32, #tpu.memory_space<vmem>>) attributes {dimension_semantics = [#tpu.dimension_semantics<parallel>, #tpu.dimension_semantics<arbitrary>], iteration_bounds = array<i64: 1, 1>, scalar_prefetch = 2 : i64, scratch_operands = 0 : i64, tpu.core_type = #tpu.core_type<tc>, window_params = [{transform_indices = @transform_0, window_bounds = array<i64: 256, 256>}, {pipeline_mode = #tpu.pipeline_mode<synchronous>, transform_indices = @transform_1, window_bounds = array<i64: 256, 128>}, {transform_indices = @transform_2, window_bounds = array<i64: 256, 1>}, {transform_indices = @transform_3, window_bounds = array<i64: 256, 128>}]} {
    %c0_i32 = arith.constant 0 : i32
    %0 = arith.cmpi eq, %arg1, %c0_i32 : i32
    %1 = arith.extui %0 : i1 to i32
    %c0_i32_0 = arith.constant 0 : i32
    %2 = arith.cmpi ne, %1, %c0_i32_0 : i32
    scf.if %2 {
      %cst = arith.constant 0.000000e+00 : f32
      %13 = vector.broadcast %cst : f32 to vector<256x128xf32>
      %c0 = arith.constant 0 : index
      %c0_5 = arith.constant 0 : index
      %14 = vector.load %arg7[%c0, %c0_5] : memref<256x128xf32, #tpu.memory_space<vmem>>, vector<256x128xf32>
      tpu.vector_store %arg7[%c0, %c0_5], %13 {strides = array<i32>} : memref<256x128xf32, #tpu.memory_space<vmem>>, vector<256x128xf32>,
    } else {
    }
    %c1_i32 = arith.constant 1 : i32
    %3 = arith.muli %arg0, %c1_i32 : i32
    %4 = arith.addi %3, %arg1 : i32
    %5 = arith.index_cast %4 : i32 to index
    %6 = memref.load %arg2[%5] : memref<1xi32, #tpu.memory_space<smem>>
    %c0_i32_1 = arith.constant 0 : i32
    %7 = arith.cmpi sgt, %6, %c0_i32_1 : i32
    %8 = arith.extui %7 : i1 to i32
    %c0_i32_2 = arith.constant 0 : i32
    %9 = arith.cmpi ne, %8, %c0_i32_2 : i32
    scf.if %9 {
      %c256_i32 = arith.constant 256 : i32
      %13 = arith.muli %arg1, %c256_i32 : i32
      %14 = tpu.assume_multiple %13, 256 : i32
      %15 = arith.index_cast %14 : i32 to index
      %c0 = arith.constant 0 : index
      %16 = vector.load %arg5[%15, %c0] : memref<256x128xbf16, #tpu.memory_space<vmem>>, vector<256x128xbf16>
      %c0_5 = arith.constant 0 : index
      %c0_6 = arith.constant 0 : index
      %17 = vector.load %arg7[%c0_5, %c0_6] : memref<256x128xf32, #tpu.memory_space<vmem>>, vector<256x128xf32>
      %c0_7 = arith.constant 0 : index
      %c0_8 = arith.constant 0 : index
      %18 = vector.load %arg4[%c0_7, %c0_8] : memref<256x256xbf16, #tpu.memory_space<vmem>>, vector<256x256xbf16>
      %cst = arith.constant dense<0.000000e+00> : vector<256x128xf32>
      %19 = tpu.matmul %18, %16, %cst {dimension_numbers = #tpu.dot_dimension_numbers<[1], [0], [0], [1], [0, 0, 1, 1], [], []>} : vector<256x256xbf16>, vector<256x128xbf16>, vector<256x128xf32> -> vector<256x128xf32>
      %20 = arith.addf %17, %19 : vector<256x128xf32>
      %c0_9 = arith.constant 0 : index
      %c0_10 = arith.constant 0 : index
      %21 = vector.load %arg7[%c0_9, %c0_10] : memref<256x128xf32, #tpu.memory_space<vmem>>, vector<256x128xf32>
      tpu.vector_store %arg7[%c0_9, %c0_10], %20 {strides = array<i32>} : memref<256x128xf32, #tpu.memory_space<vmem>>, vector<256x128xf32>,
    } else {
    }
    %c0_i32_3 = arith.constant 0 : i32
    %10 = arith.cmpi eq, %arg1, %c0_i32_3 : i32
    %11 = arith.extui %10 : i1 to i32
    %c0_i32_4 = arith.constant 0 : i32
    %12 = arith.cmpi ne, %11, %c0_i32_4 : i32
    scf.if %12 {
      %c0 = arith.constant 0 : index
      %c0_5 = arith.constant 0 : index
      %13 = vector.load %arg7[%c0, %c0_5] : memref<256x128xf32, #tpu.memory_space<vmem>>, vector<256x128xf32>
      %c0_6 = arith.constant 0 : index
      %c0_7 = arith.constant 0 : index
      %14 = vector.load %arg6[%c0_6, %c0_7] : memref<256x1xf32, #tpu.memory_space<vmem>>, vector<256x1xf32>
      %15 = vector.broadcast %14 : vector<256x1xf32> to vector<256x128xf32>
      %16 = arith.mulf %13, %15 : vector<256x128xf32>
      %c0_8 = arith.constant 0 : index
      %c0_9 = arith.constant 0 : index
      %17 = vector.load %arg7[%c0_8, %c0_9] : memref<256x128xf32, #tpu.memory_space<vmem>>, vector<256x128xf32>
      tpu.vector_store %arg7[%c0_8, %c0_9], %16 {strides = array<i32>} : memref<256x128xf32, #tpu.memory_space<vmem>>, vector<256x128xf32>,
    } else {
    }
    return
  }
  func.func @transform_0(%arg0: i32, %arg1: i32, %arg2: memref<1xi32, #tpu.memory_space<smem>>, %arg3: memref<1xi32, #tpu.memory_space<smem>>) -> (i32, i32) {
    %c1_i32 = arith.constant 1 : i32
    %0 = arith.muli %arg0, %c1_i32 : i32
    %1 = arith.addi %0, %arg1 : i32
    %2 = arith.index_cast %1 : i32 to index
    %3 = memref.load %arg3[%2] : memref<1xi32, #tpu.memory_space<smem>>
    %c0_i32 = arith.constant 0 : i32
    return %arg0, %3 : i32, i32
  }
  func.func @transform_1(%arg0: i32, %arg1: i32, %arg2: memref<1xi32, #tpu.memory_space<smem>>, %arg3: memref<1xi32, #tpu.memory_space<smem>>) -> (i32, i32) {
    %c0_i32 = arith.constant 0 : i32
    %c0_i32_0 = arith.constant 0 : i32
    %c0_i32_1 = arith.constant 0 : i32
    return %c0_i32, %c0_i32_0 : i32, i32
  }
  func.func @transform_2(%arg0: i32, %arg1: i32, %arg2: memref<1xi32, #tpu.memory_space<smem>>, %arg3: memref<1xi32, #tpu.memory_space<smem>>) -> (i32, i32) {
    %c0_i32 = arith.constant 0 : i32
    %c0_i32_0 = arith.constant 0 : i32
    return %arg0, %c0_i32 : i32, i32
  }
  func.func @transform_3(%arg0: i32, %arg1: i32, %arg2: memref<1xi32, #tpu.memory_space<smem>>, %arg3: memref<1xi32, #tpu.memory_space<smem>>) -> (i32, i32) {
    %c0_i32 = arith.constant 0 : i32
    %c0_i32_0 = arith.constant 0 : i32
    return %arg0, %c0_i32 : i32, i32
  }
}

</mosaic_0001>

<bundles_post_ra>
// kernel: tpu_custom_call.1
= control target key start
LH: loop header
LB: loop body
LE: loop exit
PB: predicated region body
PF: predicated region fallthrough
CT: control target
= control target key end

     0   :  { %12 = vsyncpa [#allocation6], 0  ;;  %s1495_s0 = inlined_call_operand.<no memory space> [shape: s32[1], index: 0, kind: input, shape index: {}]   ;;  %s1496_s1 = inlined_call_operand.<no memory space> [shape: s32[1], index: 1, kind: input, shape index: {}]   ;;  %s1497_s2 = inlined_call_operand.vmem [shape: bf16[256,256], index: 2, kind: input, shape index: {}]   ;;  %s1498_s3 = inlined_call_operand.hbm [shape: bf16[256,128], index: 3, kind: input, shape index: {}]   ;;  %s1499_s4 = inlined_call_operand.vmem [shape: f32[256,1], index: 4, kind: input, shape index: {}]   ;;  %s1500_s5 = inlined_call_operand.hbm [shape: f32[256,128], index: 5, kind: output, shape index: {}]  }
   0x1   :  { %13 = vsyncpa [#allocation7], 0  ;;  %s1298_s18 = smov [#allocation5]  }
   0x2   :  { %s31_s19 = sshll.u32 %s1298_s18, 4  ;;  %s32_s19 = int_to_ptr.vmem [resolvable:$true] %s31_s19 }
   0x3   :  { %s1262_s20 = scalar_lea.vmem %s32_s19, 2048  ;;  %p1267_p1 = scmp.lt.s32.totalorder %s32_s19, %s32_s19 }
   0x4   :  { %p1263_p0 = scmp.ne.s32.totalorder %s32_s19, %s1262_s20  ;;  %p1268_p2 = scmp.lt.s32.totalorder %s1262_s20, %s1262_s20 }
   0x6   :  { %p1269_p3 = por %p1268_p2, %p1267_p1 }
   0x8   :  { %p1270_p4 = pnand %p1269_p3, %p1263_p0 }
   0xa   :  { %1273 = shalt.err (!%p1270_p4)
}
   0xb   :  { %s1299_s21 = smov 64   ;;  %s1300_s22 = smov 4  }
   0xc   :  { %37 = dma.hbm_to_vmem [thread:$0]  %s1498_s3, 2048, %s32_s19, [#allocation6], %s1299_s21, %s1299_s21, %s1300_s22  }
   0xd   :  { %1294 = dma.done.wait [#allocation6], 2048  }
   0xe   :  { %1295 = vsyncadd [#allocation6], 4294965248  ;;  %s1001_s27 = sshll.u32 %s1496_s1, 1  ;;  %v1301_v0 = vmov 0.0   ;;  %p1003_p6 = scmp.le.s32.totalorder %s1495_s0, 0 }
   0xf   :  { %p1346_p5 = scmp.lt.s32.totalorder %s1001_s27, 1  ;;  %65 = vst [vmem:[#allocation8] sm:$0xff] %v1301_v0  ;;  %66 = vst [vmem:[#allocation8 + $0x8] sm:$0xff] %v1301_v0 }
  0x10   :  { %67 = vst [vmem:[#allocation8 + $0x10] sm:$0xff] %v1301_v0  ;;  %68 = vst [vmem:[#allocation8 + $0x18] sm:$0xff] %v1301_v0 }
  0x11   :  { %69 = vst [vmem:[#allocation8 + $0x20] sm:$0xff] %v1301_v0  ;;  %70 = vst [vmem:[#allocation8 + $0x28] sm:$0xff] %v1301_v0  ;;  %s1503_s27 = smov (!%p1346_p5, %s1001_s27), 1 }
  0x12   :  { %71 = vst [vmem:[#allocation8 + $0x30] sm:$0xff] %v1301_v0  ;;  %72 = vst [vmem:[#allocation8 + $0x38] sm:$0xff] %v1301_v0  ;;  %s1002_s7 = sshll.u32 %s1503_s27, 2 }
  0x13   :  { %73 = vst [vmem:[#allocation8 + $0x40] sm:$0xff] %v1301_v0  ;;  %74 = vst [vmem:[#allocation8 + $0x48] sm:$0xff] %v1301_v0  ;;  %s1359_s10 = scalar_lea.vmem %s1497_s2, %s1002_s7 }
  0x14   :  { %75 = vst [vmem:[#allocation8 + $0x50] sm:$0xff] %v1301_v0  ;;  %76 = vst [vmem:[#allocation8 + $0x58] sm:$0xff] %v1301_v0 }
  0x15   :  { %77 = vst [vmem:[#allocation8 + $0x60] sm:$0xff] %v1301_v0  ;;  %78 = vst [vmem:[#allocation8 + $0x68] sm:$0xff] %v1301_v0 }
  0x16   :  { %79 = vst [vmem:[#allocation8 + $0x70] sm:$0xff] %v1301_v0  ;;  %80 = vst [vmem:[#allocation8 + $0x78] sm:$0xff] %v1301_v0 }
  0x17   :  { %81 = vst [vmem:[#allocation8 + $0x80] sm:$0xff] %v1301_v0  ;;  %82 = vst [vmem:[#allocation8 + $0x88] sm:$0xff] %v1301_v0 }
  0x18   :  { %83 = vst [vmem:[#allocation8 + $0x90] sm:$0xff] %v1301_v0  ;;  %84 = vst [vmem:[#allocation8 + $0x98] sm:$0xff] %v1301_v0 }
  0x19   :  { %85 = vst [vmem:[#allocation8 + $0xa0] sm:$0xff] %v1301_v0  ;;  %86 = vst [vmem:[#allocation8 + $0xa8] sm:$0xff] %v1301_v0 }
  0x1a   :  { %87 = vst [vmem:[#allocation8 + $0xb0] sm:$0xff] %v1301_v0  ;;  %88 = vst [vmem:[#allocation8 + $0xb8] sm:$0xff] %v1301_v0  ;;  %102 = sbr.rel (%p1003_p6) target bundleno = 324 (0x144), region = 25 }
  0x1b   :  { %89 = vst [vmem:[#allocation8 + $0xc0] sm:$0xff] %v1301_v0  ;;  %90 = vst [vmem:[#allocation8 + $0xc8] sm:$0xff] %v1301_v0 }
  0x1c   :  { %91 = vst [vmem:[#allocation8 + $0xd0] sm:$0xff] %v1301_v0  ;;  %92 = vst [vmem:[#allocation8 + $0xd8] sm:$0xff] %v1301_v0 }
  0x1d   :  { %93 = vst [vmem:[#allocation8 + $0xe0] sm:$0xff] %v1301_v0  ;;  %94 = vst [vmem:[#allocation8 + $0xe8] sm:$0xff] %v1301_v0 }
  0x1e   :  { %95 = vst [vmem:[#allocation8 + $0xf0] sm:$0xff] %v1301_v0  ;;  %96 = vst [vmem:[#allocation8 + $0xf8] sm:$0xff] %v1301_v0 }
  0x1f   :  { %v1188_v1 = vld [vmem:[#allocation5 + $0x78] sm:$0xff]   ;;  %v1190_v3 = vld [vmem:[#allocation5 + $0x70] sm:$0xff]   ;;  %v1192_v5 = vld [vmem:[#allocation5 + $0x68] sm:$0xff]  }
  0x20   :  { %v1189_v2 = vld [vmem:[#allocation5 + $0x38] sm:$0xff]   ;;  %1052 = vmatprep.subr.bf16.mxu0 %v1188_v1  ;;  %1164 = vmatprep.subr.bf16.mxu1 %v1188_v1  ;;  %v1191_v4 = vld [vmem:[#allocation5 + $0x30] sm:$0xff]   ;;  %v1193_v6 = vld [vmem:[#allocation5 + $0x28] sm:$0xff]  }
  0x21   :  { %1053 = vmatpush3.bf16.msra.mxu0 %v1189_v2  ;;  %1172 = vmatpush3.bf16.msra.mxu1 %v1189_v2  ;;  %v1194_v7 = vld [vmem:[#allocation5 + $0x60] sm:$0xff]   ;;  %v1196_v9 = vld [vmem:[#allocation5 + $0x58] sm:$0xff]   ;;  %v1198_v11 = vld [vmem:[#allocation5 + $0x50] sm:$0xff]  }
  0x22   :  { %1054 = vmatprep.subr.bf16.mxu0 %v1190_v3  ;;  %1165 = vmatprep.subr.bf16.mxu1 %v1190_v3  ;;  %v1195_v8 = vld [vmem:[#allocation5 + $0x20] sm:$0xff]   ;;  %v1197_v10 = vld [vmem:[#allocation5 + $0x18] sm:$0xff]   ;;  %v1199_v14 = vld [vmem:[#allocation5 + $0x10] sm:$0xff]  }
  0x23   :  { %v1206_v12 = vld [vmem:[%s1359_s10 + $0x4] ss:$8 sps:$4 sm:$0xff]   ;;  %v1204_v19 = vld [vmem:[%s1359_s10] ss:$8 sps:$4 sm:$0xff]   ;;  %v1210_v21 = vld [vmem:[%s1359_s10 + $0x14] ss:$8 sps:$4 sm:$0xff]  }
  0x24   :  { %v1209_v13 = vld [vmem:[%s1359_s10 + $0x84] ss:$8 sps:$4 sm:$0xff]   ;;  %492 = vmatprep.mubr.bf16.mxu0 %v1206_v12  ;;  %v1207_v20 = vld [vmem:[%s1359_s10 + $0x80] ss:$8 sps:$4 sm:$0xff]   ;;  %v1212_v22 = vld [vmem:[%s1359_s10 + $0x94] ss:$8 sps:$4 sm:$0xff]  }
  0x25   :  { %1055 = vmatpush3.bf16.msra.mxu0 %v1191_v4  ;;  %1173 = vmatpush3.bf16.msra.mxu1 %v1191_v4  ;;  %v1200_v15 = vld [vmem:[#allocation5 + $0x48] sm:$0xff]   ;;  %v1202_v17 = vld [vmem:[#allocation5 + $0x40] sm:$0xff]   ;;  %v1214_v23 = vld [vmem:[%s1359_s10 + $0x10] ss:$8 sps:$4 sm:$0xff]  }
  0x26   :  { %1056 = vmatprep.subr.bf16.mxu0 %v1192_v5  ;;  %1166 = vmatprep.subr.bf16.mxu1 %v1192_v5  ;;  %v1201_v16 = vld [vmem:[#allocation5 + $0x8] sm:$0xff]   ;;  %v1203_v18 = vld [vmem:[#allocation5] sm:$0xff]   ;;  %v1215_v24 = vld [vmem:[%s1359_s10 + $0x90] ss:$8 sps:$4 sm:$0xff]  }
  0x27   :  { %556 = vmatprep.mubr.bf16.mxu1 %v1209_v13  ;;  %v1216_v25 = vld [vmem:[%s1359_s10 + $0x24] ss:$8 sps:$4 sm:$0xff]   ;;  %v1220_v27 = vld [vmem:[%s1359_s10 + $0x20] ss:$8 sps:$4 sm:$0xff]   ;;  %v1222_v29 = vld [vmem:[%s1359_s10 + $0x34] ss:$8 sps:$4 sm:$0xff]  }
  0x28   :  { %v1218_v26 = vld [vmem:[%s1359_s10 + $0xa4] ss:$8 sps:$4 sm:$0xff]   ;;  %v1221_v28 = vld [vmem:[%s1359_s10 + $0xa0] ss:$8 sps:$4 sm:$0xff]   ;;  %v1224_v30 = vld [vmem:[%s1359_s10 + $0xb4] ss:$8 sps:$4 sm:$0xff]  }
  0x29   :  { %1057 = vmatpush3.bf16.msra.mxu0 %v1193_v6  ;;  %1174 = vmatpush3.bf16.msra.mxu1 %v1193_v6  ;;  %v1226_v31 = vld [vmem:[%s1359_s10 + $0x30] ss:$8 sps:$4 sm:$0xff]   ;;  %v1228_v33 = vld [vmem:[%s1359_s10 + $0x44] ss:$8 sps:$4 sm:$0xff]   ;;  %v1232_v35 = vld [vmem:[%s1359_s10 + $0x40] ss:$8 sps:$4 sm:$0xff]  }
  0x2a   :  { %1058 = vmatprep.subr.bf16.mxu0 %v1194_v7  ;;  %1167 = vmatprep.subr.bf16.mxu1 %v1194_v7  ;;  %v1227_v32 = vld [vmem:[%s1359_s10 + $0xb0] ss:$8 sps:$4 sm:$0xff]   ;;  %v1230_v34 = vld [vmem:[%s1359_s10 + $0xc4] ss:$8 sps:$4 sm:$0xff]   ;;  %v1233_v36 = vld [vmem:[%s1359_s10 + $0xc0] ss:$8 sps:$4 sm:$0xff]  }
  0x2b   :  { %v1234_v37 = vld [vmem:[%s1359_s10 + $0x54] ss:$8 sps:$4 sm:$0xff]   ;;  %v1238_v39 = vld [vmem:[%s1359_s10 + $0x50] ss:$8 sps:$4 sm:$0xff]   ;;  %v1240_v41 = vld [vmem:[%s1359_s10 + $0x64] ss:$8 sps:$4 sm:$0xff]  }
  0x2c   :  { %v1236_v38 = vld [vmem:[%s1359_s10 + $0xd4] ss:$8 sps:$4 sm:$0xff]   ;;  %v1239_v40 = vld [vmem:[%s1359_s10 + $0xd0] ss:$8 sps:$4 sm:$0xff]   ;;  %v1242_v42 = vld [vmem:[%s1359_s10 + $0xe4] ss:$8 sps:$4 sm:$0xff]  }
  0x2d   :  { %1059 = vmatpush3.bf16.msra.mxu0 %v1195_v8  ;;  %1175 = vmatpush3.bf16.msra.mxu1 %v1195_v8  ;;  %v1244_v43 = vld [vmem:[%s1359_s10 + $0x60] ss:$8 sps:$4 sm:$0xff]   ;;  %v1246_v45 = vld [vmem:[%s1359_s10 + $0x74] ss:$8 sps:$4 sm:$0xff]   ;;  %v1250_v47 = vld [vmem:[%s1359_s10 + $0x70] ss:$8 sps:$4 sm:$0xff]  }
  0x2e   :  { %1060 = vmatprep.subr.bf16.mxu0 %v1196_v9  ;;  %1168 = vmatprep.subr.bf16.mxu1 %v1196_v9  ;;  %v1245_v44 = vld [vmem:[%s1359_s10 + $0xe0] ss:$8 sps:$4 sm:$0xff]   ;;  %v1248_v46 = vld [vmem:[%s1359_s10 + $0xf4] ss:$8 sps:$4 sm:$0xff]   ;;  %v1251_v48 = vld [vmem:[%s1359_s10 + $0xf0] ss:$8 sps:$4 sm:$0xff]  }
  0x2f   :  { %v140_v51 = vld [vmem:[#allocation8] sm:$0xff]  ;;  %v141_v61 = vld [vmem:[#allocation8 + $0x8] sm:$0xff]  ;;  %v142_v7 = vld [vmem:[#allocation8 + $0x10] sm:$0xff] }
  0x30   :  { %v156_v53 = vld [vmem:[#allocation8 + $0x80] sm:$0xff]  ;;  %v157_v63 = vld [vmem:[#allocation8 + $0x88] sm:$0xff]  ;;  %v158_v9 = vld [vmem:[#allocation8 + $0x90] sm:$0xff] }
  0x31   :  { %1061 = vmatpush3.bf16.msra.mxu0 %v1197_v10  ;;  %1176 = vmatpush3.bf16.msra.mxu1 %v1197_v10 }
  0x32   :  { %1062 = vmatprep.subr.bf16.mxu0 %v1198_v11  ;;  %1169 = vmatprep.subr.bf16.mxu1 %v1198_v11 }
  0x35   :  { %1063 = vmatpush3.bf16.msra.mxu0 %v1199_v14  ;;  %1177 = vmatpush3.bf16.msra.mxu1 %v1199_v14 }
  0x36   :  { %1064 = vmatprep.subr.bf16.mxu0 %v1200_v15  ;;  %1170 = vmatprep.subr.bf16.mxu1 %v1200_v15 }
  0x39   :  { %1065 = vmatpush3.bf16.msra.mxu0 %v1201_v16  ;;  %1178 = vmatpush3.bf16.msra.mxu1 %v1201_v16 }
  0x3a   :  { %1066 = vmatprep.subr.bf16.mxu0 %v1202_v17  ;;  %1171 = vmatprep.subr.bf16.mxu1 %v1202_v17  ;;  %v143_v17 = vld [vmem:[#allocation8 + $0x18] sm:$0xff] }
  0x3d   :  { %1067 = vmatpush3.bf16.msra.mxu0 %v1203_v18  ;;  %1179 = vmatpush3.bf16.msra.mxu1 %v1203_v18 }
  0x40   :  { %493 = vmatmul.mubr.bf16.vlgmr.msra.gmra.mxu0 %v1204_v19  ;;  %557 = vmatmul.mubr.bf16.vlgmr.msra.gmra.mxu1 %v1207_v20  ;;  %v159_v19 = vld [vmem:[#allocation8 + $0x98] sm:$0xff] }
  0x41   :  { %500 = vmatprep.mubr.bf16.mxu0 %v1210_v21  ;;  %564 = vmatprep.mubr.bf16.mxu1 %v1212_v22 }
  0x48   :  { %501 = vmatmul.mubr.bf16.gmra.mxu0 %v1214_v23  ;;  %565 = vmatmul.mubr.bf16.gmra.mxu1 %v1215_v24 }
  0x49   :  { %508 = vmatprep.mubr.bf16.mxu0 %v1216_v25  ;;  %572 = vmatprep.mubr.bf16.mxu1 %v1218_v26 }
  0x50   :  { %509 = vmatmul.mubr.bf16.gmra.mxu0 %v1220_v27  ;;  %573 = vmatmul.mubr.bf16.gmra.mxu1 %v1221_v28  ;;  %v144_v27 = vld [vmem:[#allocation8 + $0x20] sm:$0xff] }
  0x51   :  { %516 = vmatprep.mubr.bf16.mxu0 %v1222_v29  ;;  %580 = vmatprep.mubr.bf16.mxu1 %v1224_v30  ;;  %v160_v29 = vld [vmem:[#allocation8 + $0xa0] sm:$0xff] }
  0x58   :  { %517 = vmatmul.mubr.bf16.gmra.mxu0 %v1226_v31  ;;  %581 = vmatmul.mubr.bf16.gmra.mxu1 %v1227_v32 }
  0x59   :  { %524 = vmatprep.mubr.bf16.mxu0 %v1228_v33  ;;  %588 = vmatprep.mubr.bf16.mxu1 %v1230_v34 }
  0x60   :  { %525 = vmatmul.mubr.bf16.gmra.mxu0 %v1232_v35  ;;  %589 = vmatmul.mubr.bf16.gmra.mxu1 %v1233_v36 }
  0x61   :  { %532 = vmatprep.mubr.bf16.mxu0 %v1234_v37  ;;  %596 = vmatprep.mubr.bf16.mxu1 %v1236_v38  ;;  %v145_v37 = vld [vmem:[#allocation8 + $0x28] sm:$0xff] }
  0x68   :  { %533 = vmatmul.mubr.bf16.gmra.mxu0 %v1238_v39  ;;  %597 = vmatmul.mubr.bf16.gmra.mxu1 %v1239_v40  ;;  %v161_v39 = vld [vmem:[#allocation8 + $0xa8] sm:$0xff] }
  0x69   :  { %540 = vmatprep.mubr.bf16.mxu0 %v1240_v41  ;;  %604 = vmatprep.mubr.bf16.mxu1 %v1242_v42 }
  0x70   :  { %541 = vmatmul.mubr.bf16.gmra.mxu0 %v1244_v43  ;;  %605 = vmatmul.mubr.bf16.gmra.mxu1 %v1245_v44 }
  0x71   :  { %548 = vmatprep.mubr.bf16.mxu0 %v1246_v45  ;;  %612 = vmatprep.mubr.bf16.mxu1 %v1248_v46 }
  0x78   :  { %549 = vmatmul.mubr.bf16.gmra.mxu0 %v1250_v47  ;;  %613 = vmatmul.mubr.bf16.gmra.mxu1 %v1251_v48  ;;  %v146_v47 = vld [vmem:[#allocation8 + $0x30] sm:$0xff] }
 0x100   :  { %v1068_v49 = vpop.f32.mrf.mxu0  ;;  %v1116_v50 = vpop.f32.mrf.mxu1 }
 0x102   :  { %v1069_v52 = vpop.f32.mrf.mxu0  ;;  %v1117_v54 = vpop.f32.mrf.mxu1 }
 0x103   :  { %v1070_v55 = vadd.f32 %v1069_v52, %v1068_v49  ;;  %v1118_v56 = vadd.f32 %v1117_v54, %v1116_v50  ;;  %v162_v49 = vld [vmem:[#allocation8 + $0xb0] sm:$0xff] }
 0x104   :  { %v1071_v57 = vpop.f32.mrf.mxu0  ;;  %v1119_v58 = vpop.f32.mrf.mxu1 }
 0x105   :  { %v621_v59 = vadd.f32 %v1070_v55, %v140_v51  ;;  %v637_v60 = vadd.f32 %v1118_v56, %v156_v53 }
 0x106   :  { %v1072_v62 = vpop.f32.mrf.mxu0  ;;  %v1120_v0 = vpop.f32.mrf.mxu1 }
 0x107   :  { %653 = vst [vmem:[#allocation8] sm:$0xff] %v621_v59  ;;  %669 = vst [vmem:[#allocation8 + $0x80] sm:$0xff] %v637_v60  ;;  %v1073_v1 = vadd.f32 %v1072_v62, %v1071_v57  ;;  %v1121_v2 = vadd.f32 %v1120_v0, %v1119_v58  ;;  %v147_v57 = vld [vmem:[#allocation8 + $0x38] sm:$0xff] }
 0x108   :  { %v1074_v3 = vpop.f32.mrf.mxu0  ;;  %v1122_v4 = vpop.f32.mrf.mxu1  ;;  %v163_v59 = vld [vmem:[#allocation8 + $0xb8] sm:$0xff] }
 0x109   :  { %v622_v5 = vadd.f32 %v1073_v1, %v141_v61  ;;  %v638_v6 = vadd.f32 %v1121_v2, %v157_v63 }
 0x10a   :  { %v1075_v8 = vpop.f32.mrf.mxu0  ;;  %v1123_v10 = vpop.f32.mrf.mxu1 }
 0x10b   :  { %654 = vst [vmem:[#allocation8 + $0x8] sm:$0xff] %v622_v5  ;;  %670 = vst [vmem:[#allocation8 + $0x88] sm:$0xff] %v638_v6  ;;  %v1076_v11 = vadd.f32 %v1075_v8, %v1074_v3  ;;  %v1124_v12 = vadd.f32 %v1123_v10, %v1122_v4  ;;  %v148_v3 = vld [vmem:[#allocation8 + $0x40] sm:$0xff] }
 0x10c   :  { %v1077_v13 = vpop.f32.mrf.mxu0  ;;  %v1125_v14 = vpop.f32.mrf.mxu1  ;;  %v164_v5 = vld [vmem:[#allocation8 + $0xc0] sm:$0xff] }
 0x10d   :  { %v623_v15 = vadd.f32 %v1076_v11, %v142_v7  ;;  %v639_v16 = vadd.f32 %v1124_v12, %v158_v9 }
 0x10e   :  { %v1078_v18 = vpop.f32.mrf.mxu0  ;;  %v1126_v20 = vpop.f32.mrf.mxu1 }
 0x10f   :  { %655 = vst [vmem:[#allocation8 + $0x10] sm:$0xff] %v623_v15  ;;  %671 = vst [vmem:[#allocation8 + $0x90] sm:$0xff] %v639_v16  ;;  %v1079_v21 = vadd.f32 %v1078_v18, %v1077_v13  ;;  %v1127_v22 = vadd.f32 %v1126_v20, %v1125_v14  ;;  %v149_v13 = vld [vmem:[#allocation8 + $0x48] sm:$0xff] }
 0x110   :  { %v1080_v23 = vpop.f32.mrf.mxu0  ;;  %v1128_v24 = vpop.f32.mrf.mxu1  ;;  %v165_v15 = vld [vmem:[#allocation8 + $0xc8] sm:$0xff] }
 0x111   :  { %v624_v25 = vadd.f32 %v1079_v21, %v143_v17  ;;  %v640_v26 = vadd.f32 %v1127_v22, %v159_v19 }
 0x112   :  { %v1081_v28 = vpop.f32.mrf.mxu0  ;;  %v1129_v30 = vpop.f32.mrf.mxu1 }
 0x113   :  { %656 = vst [vmem:[#allocation8 + $0x18] sm:$0xff] %v624_v25  ;;  %672 = vst [vmem:[#allocation8 + $0x98] sm:$0xff] %v640_v26  ;;  %v1082_v31 = vadd.f32 %v1081_v28, %v1080_v23  ;;  %v1130_v32 = vadd.f32 %v1129_v30, %v1128_v24  ;;  %v150_v23 = vld [vmem:[#allocation8 + $0x50] sm:$0xff] }
 0x114   :  { %v1083_v33 = vpop.f32.mrf.mxu0  ;;  %v1131_v34 = vpop.f32.mrf.mxu1  ;;  %v166_v25 = vld [vmem:[#allocation8 + $0xd0] sm:$0xff] }
 0x115   :  { %v625_v35 = vadd.f32 %v1082_v31, %v144_v27  ;;  %v641_v36 = vadd.f32 %v1130_v32, %v160_v29 }
 0x116   :  { %v1084_v38 = vpop.f32.mrf.mxu0  ;;  %v1132_v40 = vpop.f32.mrf.mxu1 }
 0x117   :  { %657 = vst [vmem:[#allocation8 + $0x20] sm:$0xff] %v625_v35  ;;  %673 = vst [vmem:[#allocation8 + $0xa0] sm:$0xff] %v641_v36  ;;  %v1085_v41 = vadd.f32 %v1084_v38, %v1083_v33  ;;  %v1133_v42 = vadd.f32 %v1132_v40, %v1131_v34  ;;  %v151_v33 = vld [vmem:[#allocation8 + $0x58] sm:$0xff] }
 0x118   :  { %v1086_v43 = vpop.f32.mrf.mxu0  ;;  %v1134_v44 = vpop.f32.mrf.mxu1  ;;  %v167_v35 = vld [vmem:[#allocation8 + $0xd8] sm:$0xff] }
 0x119   :  { %v626_v45 = vadd.f32 %v1085_v41, %v145_v37  ;;  %v642_v46 = vadd.f32 %v1133_v42, %v161_v39 }
 0x11a   :  { %v1087_v48 = vpop.f32.mrf.mxu0  ;;  %v1135_v50 = vpop.f32.mrf.mxu1 }
 0x11b   :  { %658 = vst [vmem:[#allocation8 + $0x28] sm:$0xff] %v626_v45  ;;  %674 = vst [vmem:[#allocation8 + $0xa8] sm:$0xff] %v642_v46  ;;  %v1088_v51 = vadd.f32 %v1087_v48, %v1086_v43  ;;  %v1136_v52 = vadd.f32 %v1135_v50, %v1134_v44  ;;  %v152_v43 = vld [vmem:[#allocation8 + $0x60] sm:$0xff] }
 0x11c   :  { %v1089_v53 = vpop.f32.mrf.mxu0  ;;  %v1137_v54 = vpop.f32.mrf.mxu1  ;;  %v168_v45 = vld [vmem:[#allocation8 + $0xe0] sm:$0xff] }
 0x11d   :  { %v627_v55 = vadd.f32 %v1088_v51, %v146_v47  ;;  %v643_v56 = vadd.f32 %v1136_v52, %v162_v49 }
 0x11e   :  { %v1090_v58 = vpop.f32.mrf.mxu0  ;;  %v1138_v60 = vpop.f32.mrf.mxu1 }
 0x11f   :  { %659 = vst [vmem:[#allocation8 + $0x30] sm:$0xff] %v627_v55  ;;  %675 = vst [vmem:[#allocation8 + $0xb0] sm:$0xff] %v643_v56  ;;  %v1091_v61 = vadd.f32 %v1090_v58, %v1089_v53  ;;  %v1139_v62 = vadd.f32 %v1138_v60, %v1137_v54  ;;  %v153_v53 = vld [vmem:[#allocation8 + $0x68] sm:$0xff] }
 0x120   :  { %v1092_v63 = vpop.f32.mrf.mxu0  ;;  %v1140_v0 = vpop.f32.mrf.mxu1  ;;  %v169_v55 = vld [vmem:[#allocation8 + $0xe8] sm:$0xff] }
 0x121   :  { %v628_v1 = vadd.f32 %v1091_v61, %v147_v57  ;;  %v644_v2 = vadd.f32 %v1139_v62, %v163_v59 }
 0x122   :  { %v1093_v4 = vpop.f32.mrf.mxu0  ;;  %v1141_v6 = vpop.f32.mrf.mxu1 }
 0x123   :  { %660 = vst [vmem:[#allocation8 + $0x38] sm:$0xff] %v628_v1  ;;  %676 = vst [vmem:[#allocation8 + $0xb8] sm:$0xff] %v644_v2  ;;  %v1094_v7 = vadd.f32 %v1093_v4, %v1092_v63  ;;  %v1142_v8 = vadd.f32 %v1141_v6, %v1140_v0  ;;  %v154_v63 = vld [vmem:[#allocation8 + $0x70] sm:$0xff] }
 0x124   :  { %v1095_v9 = vpop.f32.mrf.mxu0  ;;  %v1143_v10 = vpop.f32.mrf.mxu1  ;;  %v170_v1 = vld [vmem:[#allocation8 + $0xf0] sm:$0xff] }
 0x125   :  { %v629_v11 = vadd.f32 %v1094_v7, %v148_v3  ;;  %v645_v12 = vadd.f32 %v1142_v8, %v164_v5 }
 0x126   :  { %v1096_v14 = vpop.f32.mrf.mxu0  ;;  %v1144_v16 = vpop.f32.mrf.mxu1 }
 0x127   :  { %661 = vst [vmem:[#allocation8 + $0x40] sm:$0xff] %v629_v11  ;;  %677 = vst [vmem:[#allocation8 + $0xc0] sm:$0xff] %v645_v12  ;;  %v1097_v17 = vadd.f32 %v1096_v14, %v1095_v9  ;;  %v1145_v18 = vadd.f32 %v1144_v16, %v1143_v10  ;;  %v155_v9 = vld [vmem:[#allocation8 + $0x78] sm:$0xff] }
 0x128   :  { %v1098_v19 = vpop.f32.mrf.mxu0  ;;  %v1146_v20 = vpop.f32.mrf.mxu1  ;;  %v171_v11 = vld [vmem:[#allocation8 + $0xf8] sm:$0xff] }
 0x129   :  { %v630_v21 = vadd.f32 %v1097_v17, %v149_v13  ;;  %v646_v22 = vadd.f32 %v1145_v18, %v165_v15 }
 0x12a   :  { %v1099_v24 = vpop.f32.mrf.mxu0  ;;  %v1147_v26 = vpop.f32.mrf.mxu1 }
 0x12b   :  { %662 = vst [vmem:[#allocation8 + $0x48] sm:$0xff] %v630_v21  ;;  %678 = vst [vmem:[#allocation8 + $0xc8] sm:$0xff] %v646_v22  ;;  %v1100_v27 = vadd.f32 %v1099_v24, %v1098_v19  ;;  %v1148_v28 = vadd.f32 %v1147_v26, %v1146_v20 }
 0x12c   :  { %v1101_v29 = vpop.f32.mrf.mxu0  ;;  %v1149_v30 = vpop.f32.mrf.mxu1 }
 0x12d   :  { %v631_v31 = vadd.f32 %v1100_v27, %v150_v23  ;;  %v647_v32 = vadd.f32 %v1148_v28, %v166_v25 }
 0x12e   :  { %v1102_v34 = vpop.f32.mrf.mxu0  ;;  %v1150_v36 = vpop.f32.mrf.mxu1 }
 0x12f   :  { %663 = vst [vmem:[#allocation8 + $0x50] sm:$0xff] %v631_v31  ;;  %679 = vst [vmem:[#allocation8 + $0xd0] sm:$0xff] %v647_v32  ;;  %v1103_v37 = vadd.f32 %v1102_v34, %v1101_v29  ;;  %v1151_v38 = vadd.f32 %v1150_v36, %v1149_v30 }
 0x130   :  { %v1104_v39 = vpop.f32.mrf.mxu0  ;;  %v1152_v40 = vpop.f32.mrf.mxu1 }
 0x131   :  { %v632_v41 = vadd.f32 %v1103_v37, %v151_v33  ;;  %v648_v42 = vadd.f32 %v1151_v38, %v167_v35 }
 0x132   :  { %v1105_v44 = vpop.f32.mrf.mxu0  ;;  %v1153_v46 = vpop.f32.mrf.mxu1 }
 0x133   :  { %664 = vst [vmem:[#allocation8 + $0x58] sm:$0xff] %v632_v41  ;;  %680 = vst [vmem:[#allocation8 + $0xd8] sm:$0xff] %v648_v42  ;;  %v1106_v47 = vadd.f32 %v1105_v44, %v1104_v39  ;;  %v1154_v48 = vadd.f32 %v1153_v46, %v1152_v40 }
 0x134   :  { %v1107_v49 = vpop.f32.mrf.mxu0  ;;  %v1155_v50 = vpop.f32.mrf.mxu1 }
 0x135   :  { %v633_v51 = vadd.f32 %v1106_v47, %v152_v43  ;;  %v649_v52 = vadd.f32 %v1154_v48, %v168_v45 }
 0x136   :  { %v1108_v54 = vpop.f32.mrf.mxu0  ;;  %v1156_v56 = vpop.f32.mrf.mxu1 }
 0x137   :  { %665 = vst [vmem:[#allocation8 + $0x60] sm:$0xff] %v633_v51  ;;  %681 = vst [vmem:[#allocation8 + $0xe0] sm:$0xff] %v649_v52  ;;  %v1109_v57 = vadd.f32 %v1108_v54, %v1107_v49  ;;  %v1157_v58 = vadd.f32 %v1156_v56, %v1155_v50 }
 0x138   :  { %v1110_v59 = vpop.f32.mrf.mxu0  ;;  %v1158_v60 = vpop.f32.mrf.mxu1 }
 0x139   :  { %v634_v61 = vadd.f32 %v1109_v57, %v153_v53  ;;  %v650_v62 = vadd.f32 %v1157_v58, %v169_v55 }
 0x13a   :  { %v1111_v0 = vpop.f32.mrf.mxu0  ;;  %v1159_v2 = vpop.f32.mrf.mxu1 }
 0x13b   :  { %666 = vst [vmem:[#allocation8 + $0x68] sm:$0xff] %v634_v61  ;;  %682 = vst [vmem:[#allocation8 + $0xe8] sm:$0xff] %v650_v62  ;;  %v1112_v3 = vadd.f32 %v1111_v0, %v1110_v59  ;;  %v1160_v4 = vadd.f32 %v1159_v2, %v1158_v60 }
 0x13c   :  { %v1113_v5 = vpop.f32.mrf.mxu0  ;;  %v1161_v6 = vpop.f32.mrf.mxu1 }
 0x13d   :  { %v635_v7 = vadd.f32 %v1112_v3, %v154_v63  ;;  %v651_v8 = vadd.f32 %v1160_v4, %v170_v1 }
 0x13e   :  { %v1114_v10 = vpop.f32.mrf.mxu0  ;;  %v1162_v12 = vpop.f32.mrf.mxu1 }
 0x13f   :  { %667 = vst [vmem:[#allocation8 + $0x70] sm:$0xff] %v635_v7  ;;  %683 = vst [vmem:[#allocation8 + $0xf0] sm:$0xff] %v651_v8  ;;  %v1115_v13 = vadd.f32 %v1114_v10, %v1113_v5  ;;  %v1163_v14 = vadd.f32 %v1162_v12, %v1161_v6 }
 0x141   :  { %v636_v15 = vadd.f32 %v1115_v13, %v155_v9  ;;  %v652_v16 = vadd.f32 %v1163_v14, %v171_v11 }
 0x143   :  { %668 = vst [vmem:[#allocation8 + $0x78] sm:$0xff] %v636_v15  ;;  %684 = vst [vmem:[#allocation8 + $0xf8] sm:$0xff] %v652_v16 }
 0x144 PF:  { %v722_v17 = vld [vmem:[%s1499_s4 + $0x10] sm:$0xff]  ;;  %v720_v18 = vld [vmem:[%s1499_s4] sm:$0xff]  ;;  %v1302_v19 = vmov 0   ;;  %v723_v20 = vld [vmem:[%s1499_s4 + $0x18] sm:$0xff] }
 0x145   :  { %1253 = vset.pattern.permute.xlu1 %v1302_v19  ;;  %1252 = vset.pattern.permute.xlu0 %v1302_v19  ;;  %v721_v21 = vld [vmem:[%s1499_s4 + $0x8] sm:$0xff]  ;;  %v724_v23 = vld [vmem:[%s1499_s4 + $0x20] sm:$0xff]  ;;  %v727_v24 = vld [vmem:[%s1499_s4 + $0x38] sm:$0xff] }
 0x146   :  { %764 = vperm.xlu1 %1253, %v722_v17   ;;  %754 = vperm.xlu0 %1252, %v720_v18   ;;  %v725_v22 = vld [vmem:[%s1499_s4 + $0x28] sm:$0xff]  ;;  %v726_v25 = vld [vmem:[%s1499_s4 + $0x30] sm:$0xff]  ;;  %v728_v27 = vld [vmem:[%s1499_s4 + $0x40] sm:$0xff] }
 0x147   :  { %v729_v26 = vld [vmem:[%s1499_s4 + $0x48] sm:$0xff]  ;;  %v731_v28 = vld [vmem:[%s1499_s4 + $0x58] sm:$0xff]  ;;  %v730_v29 = vld [vmem:[%s1499_s4 + $0x50] sm:$0xff] }
 0x148   :  { %v733_v30 = vld [vmem:[%s1499_s4 + $0x68] sm:$0xff]  ;;  %v732_v31 = vld [vmem:[%s1499_s4 + $0x60] sm:$0xff]  ;;  %v735_v32 = vld [vmem:[%s1499_s4 + $0x78] sm:$0xff] }
 0x149   :  { %v734_v33 = vld [vmem:[%s1499_s4 + $0x70] sm:$0xff]  ;;  %v737_v34 = vld [vmem:[%s1499_s4 + $0x88] sm:$0xff]  ;;  %v736_v35 = vld [vmem:[%s1499_s4 + $0x80] sm:$0xff] }
 0x14a   :  { %769 = vperm.xlu1 %1253, %v723_v20   ;;  %759 = vperm.xlu0 %1252, %v721_v21   ;;  %v739_v36 = vld [vmem:[%s1499_s4 + $0x98] sm:$0xff]  ;;  %v738_v37 = vld [vmem:[%s1499_s4 + $0x90] sm:$0xff]  ;;  %v741_v38 = vld [vmem:[%s1499_s4 + $0xa8] sm:$0xff] }
 0x14b   :  { %v740_v39 = vld [vmem:[%s1499_s4 + $0xa0] sm:$0xff]  ;;  %v743_v40 = vld [vmem:[%s1499_s4 + $0xb8] sm:$0xff]  ;;  %v742_v41 = vld [vmem:[%s1499_s4 + $0xb0] sm:$0xff] }
 0x14c   :  { %v745_v42 = vld [vmem:[%s1499_s4 + $0xc8] sm:$0xff]  ;;  %v744_v43 = vld [vmem:[%s1499_s4 + $0xc0] sm:$0xff]  ;;  %v747_v44 = vld [vmem:[%s1499_s4 + $0xd8] sm:$0xff] }
 0x14d   :  { %v746_v45 = vld [vmem:[%s1499_s4 + $0xd0] sm:$0xff]  ;;  %v749_v46 = vld [vmem:[%s1499_s4 + $0xe8] sm:$0xff]  ;;  %v748_v47 = vld [vmem:[%s1499_s4 + $0xe0] sm:$0xff] }
 0x14e   :  { %779 = vperm.xlu1 %1253, %v725_v22   ;;  %774 = vperm.xlu0 %1252, %v724_v23   ;;  %v751_v48 = vld [vmem:[%s1499_s4 + $0xf8] sm:$0xff]  ;;  %v750_v49 = vld [vmem:[%s1499_s4 + $0xf0] sm:$0xff]  ;;  %v688_v51 = vld [vmem:[#allocation8] sm:$0xff]  ;;  %s1303_s4 = smov [#allocation8]  }
 0x14f   :  { %v690_v50 = vld [vmem:[#allocation8 + $0x10] sm:$0xff]  ;;  %v691_v56 = vld [vmem:[#allocation8 + $0x18] sm:$0xff]  ;;  %v689_v57 = vld [vmem:[#allocation8 + $0x8] sm:$0xff]  ;;  %s981_s16 = sshll.u32 %s1303_s4, 4  ;;  %s982_s16 = int_to_ptr.vmem [resolvable:$true] %s981_s16 }
 0x150   :  { %v693_v62 = vld [vmem:[#allocation8 + $0x28] sm:$0xff]  ;;  %v692_v63 = vld [vmem:[#allocation8 + $0x20] sm:$0xff]  ;;  %v695_v4 = vld [vmem:[#allocation8 + $0x38] sm:$0xff]  ;;  %s1274_s17 = scalar_lea.vmem %s982_s16, 4096  ;;  %p1279_p8 = scmp.lt.s32.totalorder %s982_s16, %s982_s16 }
 0x151   :  { %v694_v5 = vld [vmem:[#allocation8 + $0x30] sm:$0xff]  ;;  %v697_v10 = vld [vmem:[#allocation8 + $0x48] sm:$0xff]  ;;  %v696_v11 = vld [vmem:[#allocation8 + $0x40] sm:$0xff]  ;;  %p1275_p7 = scmp.ne.s32.totalorder %s982_s16, %s1274_s17  ;;  %p1280_p9 = scmp.lt.s32.totalorder %s1274_s17, %s1274_s17 }
 0x152   :  { %789 = vperm.xlu1 %1253, %v727_v24   ;;  %784 = vperm.xlu0 %1252, %v726_v25   ;;  %v699_v16 = vld [vmem:[#allocation8 + $0x58] sm:$0xff]  ;;  %v698_v17 = vld [vmem:[#allocation8 + $0x50] sm:$0xff]  ;;  %v701_v22 = vld [vmem:[#allocation8 + $0x68] sm:$0xff] }
 0x153   :  { %v700_v23 = vld [vmem:[#allocation8 + $0x60] sm:$0xff]  ;;  %p1281_p10 = por %p1280_p9, %p1279_p8 }
 0x155   :  { %p1282_p11 = pnand %p1281_p10, %p1275_p7 }
 0x156   :  { %799 = vperm.xlu1 %1253, %v729_v26   ;;  %794 = vperm.xlu0 %1252, %v728_v27  }
 0x15a   :  { %809 = vperm.xlu1 %1253, %v731_v28   ;;  %804 = vperm.xlu0 %1252, %v730_v29   ;;  %v703_v28 = vld [vmem:[#allocation8 + $0x78] sm:$0xff]  ;;  %v702_v29 = vld [vmem:[#allocation8 + $0x70] sm:$0xff] }
 0x15e   :  { %819 = vperm.xlu1 %1253, %v733_v30   ;;  %814 = vperm.xlu0 %1252, %v732_v31  }
 0x162   :  { %829 = vperm.xlu1 %1253, %v735_v32   ;;  %824 = vperm.xlu0 %1252, %v734_v33  }
 0x166   :  { %839 = vperm.xlu1 %1253, %v737_v34   ;;  %834 = vperm.xlu0 %1252, %v736_v35   ;;  %v705_v34 = vld [vmem:[#allocation8 + $0x88] sm:$0xff]  ;;  %v704_v35 = vld [vmem:[#allocation8 + $0x80] sm:$0xff] }
 0x16a   :  { %849 = vperm.xlu1 %1253, %v739_v36   ;;  %844 = vperm.xlu0 %1252, %v738_v37  }
 0x16e   :  { %859 = vperm.xlu1 %1253, %v741_v38   ;;  %854 = vperm.xlu0 %1252, %v740_v39  }
 0x172   :  { %869 = vperm.xlu1 %1253, %v743_v40   ;;  %864 = vperm.xlu0 %1252, %v742_v41   ;;  %v707_v40 = vld [vmem:[#allocation8 + $0x98] sm:$0xff]  ;;  %v706_v41 = vld [vmem:[#allocation8 + $0x90] sm:$0xff] }
 0x176   :  { %879 = vperm.xlu1 %1253, %v745_v42   ;;  %874 = vperm.xlu0 %1252, %v744_v43  }
 0x17a   :  { %889 = vperm.xlu1 %1253, %v747_v44   ;;  %884 = vperm.xlu0 %1252, %v746_v45  }
 0x17e   :  { %899 = vperm.xlu1 %1253, %v749_v46   ;;  %894 = vperm.xlu0 %1252, %v748_v47   ;;  %v709_v46 = vld [vmem:[#allocation8 + $0xa8] sm:$0xff]  ;;  %v708_v47 = vld [vmem:[#allocation8 + $0xa0] sm:$0xff] }
 0x182   :  { %909 = vperm.xlu1 %1253, %v751_v48   ;;  %904 = vperm.xlu0 %1252, %v750_v49  }
 0x1c1   :  { %v765_v52 = vpop.permute.xlu1 %764  ;;  %v755_v53 = vpop.permute.xlu0 %754 }
 0x1c2   :  { %v914_v54 = vmul.f32 %v765_v52, %v690_v50  ;;  %v912_v55 = vmul.f32 %v755_v53, %v688_v51  ;;  %v711_v52 = vld [vmem:[#allocation8 + $0xb8] sm:$0xff]  ;;  %v710_v53 = vld [vmem:[#allocation8 + $0xb0] sm:$0xff] }
 0x1c4   :  { %946 = vst [vmem:[#allocation8 + $0x10] sm:$0xff] %v914_v54  ;;  %944 = vst [vmem:[#allocation8] sm:$0xff] %v912_v55 }
 0x1c5   :  { %v770_v58 = vpop.permute.xlu1 %769  ;;  %v760_v59 = vpop.permute.xlu0 %759 }
 0x1c6   :  { %v915_v60 = vmul.f32 %v770_v58, %v691_v56  ;;  %v913_v61 = vmul.f32 %v760_v59, %v689_v57  ;;  %v713_v58 = vld [vmem:[#allocation8 + $0xc8] sm:$0xff]  ;;  %v712_v59 = vld [vmem:[#allocation8 + $0xc0] sm:$0xff] }
 0x1c8   :  { %947 = vst [vmem:[#allocation8 + $0x18] sm:$0xff] %v915_v60  ;;  %945 = vst [vmem:[#allocation8 + $0x8] sm:$0xff] %v913_v61 }
 0x1c9   :  { %v780_v0 = vpop.permute.xlu1 %779  ;;  %v775_v1 = vpop.permute.xlu0 %774 }
 0x1ca   :  { %v917_v2 = vmul.f32 %v780_v0, %v693_v62  ;;  %v916_v3 = vmul.f32 %v775_v1, %v692_v63  ;;  %v715_v0 = vld [vmem:[#allocation8 + $0xd8] sm:$0xff]  ;;  %v714_v1 = vld [vmem:[#allocation8 + $0xd0] sm:$0xff] }
 0x1cc   :  { %949 = vst [vmem:[#allocation8 + $0x28] sm:$0xff] %v917_v2  ;;  %948 = vst [vmem:[#allocation8 + $0x20] sm:$0xff] %v916_v3 }
 0x1cd   :  { %v790_v6 = vpop.permute.xlu1 %789  ;;  %v785_v7 = vpop.permute.xlu0 %784 }
 0x1ce   :  { %v919_v8 = vmul.f32 %v790_v6, %v695_v4  ;;  %v918_v9 = vmul.f32 %v785_v7, %v694_v5  ;;  %v717_v6 = vld [vmem:[#allocation8 + $0xe8] sm:$0xff]  ;;  %v716_v7 = vld [vmem:[#allocation8 + $0xe0] sm:$0xff] }
 0x1d0   :  { %951 = vst [vmem:[#allocation8 + $0x38] sm:$0xff] %v919_v8  ;;  %950 = vst [vmem:[#allocation8 + $0x30] sm:$0xff] %v918_v9 }
 0x1d1   :  { %v800_v12 = vpop.permute.xlu1 %799  ;;  %v795_v13 = vpop.permute.xlu0 %794 }
 0x1d2   :  { %v921_v14 = vmul.f32 %v800_v12, %v697_v10  ;;  %v920_v15 = vmul.f32 %v795_v13, %v696_v11  ;;  %v719_v12 = vld [vmem:[#allocation8 + $0xf8] sm:$0xff]  ;;  %v718_v13 = vld [vmem:[#allocation8 + $0xf0] sm:$0xff] }
 0x1d4   :  { %953 = vst [vmem:[#allocation8 + $0x48] sm:$0xff] %v921_v14  ;;  %952 = vst [vmem:[#allocation8 + $0x40] sm:$0xff] %v920_v15 }
 0x1d5   :  { %v810_v18 = vpop.permute.xlu1 %809  ;;  %v805_v19 = vpop.permute.xlu0 %804 }
 0x1d6   :  { %v923_v20 = vmul.f32 %v810_v18, %v699_v16  ;;  %v922_v21 = vmul.f32 %v805_v19, %v698_v17 }
 0x1d8   :  { %955 = vst [vmem:[#allocation8 + $0x58] sm:$0xff] %v923_v20  ;;  %954 = vst [vmem:[#allocation8 + $0x50] sm:$0xff] %v922_v21 }
 0x1d9   :  { %v820_v24 = vpop.permute.xlu1 %819  ;;  %v815_v25 = vpop.permute.xlu0 %814 }
 0x1da   :  { %v925_v26 = vmul.f32 %v820_v24, %v701_v22  ;;  %v924_v27 = vmul.f32 %v815_v25, %v700_v23 }
 0x1dc   :  { %957 = vst [vmem:[#allocation8 + $0x68] sm:$0xff] %v925_v26  ;;  %956 = vst [vmem:[#allocation8 + $0x60] sm:$0xff] %v924_v27 }
 0x1dd   :  { %v830_v30 = vpop.permute.xlu1 %829  ;;  %v825_v31 = vpop.permute.xlu0 %824 }
 0x1de   :  { %v927_v32 = vmul.f32 %v830_v30, %v703_v28  ;;  %v926_v33 = vmul.f32 %v825_v31, %v702_v29 }
 0x1e0   :  { %959 = vst [vmem:[#allocation8 + $0x78] sm:$0xff] %v927_v32  ;;  %958 = vst [vmem:[#allocation8 + $0x70] sm:$0xff] %v926_v33 }
 0x1e1   :  { %v840_v36 = vpop.permute.xlu1 %839  ;;  %v835_v37 = vpop.permute.xlu0 %834 }
 0x1e2   :  { %v929_v38 = vmul.f32 %v840_v36, %v705_v34  ;;  %v928_v39 = vmul.f32 %v835_v37, %v704_v35 }
 0x1e4   :  { %961 = vst [vmem:[#allocation8 + $0x88] sm:$0xff] %v929_v38  ;;  %960 = vst [vmem:[#allocation8 + $0x80] sm:$0xff] %v928_v39 }
 0x1e5   :  { %v850_v42 = vpop.permute.xlu1 %849  ;;  %v845_v43 = vpop.permute.xlu0 %844 }
 0x1e6   :  { %v931_v44 = vmul.f32 %v850_v42, %v707_v40  ;;  %v930_v45 = vmul.f32 %v845_v43, %v706_v41 }
 0x1e8   :  { %963 = vst [vmem:[#allocation8 + $0x98] sm:$0xff] %v931_v44  ;;  %962 = vst [vmem:[#allocation8 + $0x90] sm:$0xff] %v930_v45 }
 0x1e9   :  { %v860_v48 = vpop.permute.xlu1 %859  ;;  %v855_v49 = vpop.permute.xlu0 %854 }
 0x1ea   :  { %v933_v50 = vmul.f32 %v860_v48, %v709_v46  ;;  %v932_v51 = vmul.f32 %v855_v49, %v708_v47 }
 0x1ec   :  { %965 = vst [vmem:[#allocation8 + $0xa8] sm:$0xff] %v933_v50  ;;  %964 = vst [vmem:[#allocation8 + $0xa0] sm:$0xff] %v932_v51 }
 0x1ed   :  { %v870_v54 = vpop.permute.xlu1 %869  ;;  %v865_v55 = vpop.permute.xlu0 %864 }
 0x1ee   :  { %v935_v56 = vmul.f32 %v870_v54, %v711_v52  ;;  %v934_v57 = vmul.f32 %v865_v55, %v710_v53 }
 0x1f0   :  { %967 = vst [vmem:[#allocation8 + $0xb8] sm:$0xff] %v935_v56  ;;  %966 = vst [vmem:[#allocation8 + $0xb0] sm:$0xff] %v934_v57 }
 0x1f1   :  { %v880_v60 = vpop.permute.xlu1 %879  ;;  %v875_v61 = vpop.permute.xlu0 %874 }
 0x1f2   :  { %v937_v62 = vmul.f32 %v880_v60, %v713_v58  ;;  %v936_v63 = vmul.f32 %v875_v61, %v712_v59 }
 0x1f4   :  { %969 = vst [vmem:[#allocation8 + $0xc8] sm:$0xff] %v937_v62  ;;  %968 = vst [vmem:[#allocation8 + $0xc0] sm:$0xff] %v936_v63 }
 0x1f5   :  { %v890_v2 = vpop.permute.xlu1 %889  ;;  %v885_v3 = vpop.permute.xlu0 %884 }
 0x1f6   :  { %v939_v4 = vmul.f32 %v890_v2, %v715_v0  ;;  %v938_v5 = vmul.f32 %v885_v3, %v714_v1 }
 0x1f8   :  { %971 = vst [vmem:[#allocation8 + $0xd8] sm:$0xff] %v939_v4  ;;  %970 = vst [vmem:[#allocation8 + $0xd0] sm:$0xff] %v938_v5 }
 0x1f9   :  { %v900_v8 = vpop.permute.xlu1 %899  ;;  %v895_v9 = vpop.permute.xlu0 %894 }
 0x1fa   :  { %v941_v10 = vmul.f32 %v900_v8, %v717_v6  ;;  %v940_v11 = vmul.f32 %v895_v9, %v716_v7 }
 0x1fc   :  { %973 = vst [vmem:[#allocation8 + $0xe8] sm:$0xff] %v941_v10  ;;  %972 = vst [vmem:[#allocation8 + $0xe0] sm:$0xff] %v940_v11 }
 0x1fd   :  { %v910_v14 = vpop.permute.xlu1 %909  ;;  %v905_v15 = vpop.permute.xlu0 %904 }
 0x1fe   :  { %v943_v16 = vmul.f32 %v910_v14, %v719_v12  ;;  %v942_v17 = vmul.f32 %v905_v15, %v718_v13 }
 0x200   :  { %975 = vst [vmem:[#allocation8 + $0xf8] sm:$0xff] %v943_v16  ;;  %974 = vst [vmem:[#allocation8 + $0xf0] sm:$0xff] %v942_v17 }
 0x201   :  { %1285 = shalt.err (!%p1282_p11)
}
 0x202   :  { %s1304_s18 = smov 128   ;;  %s1305_s19 = smov 8  }
 0x203   :  { %987 = dma.vmem_to_hbm [thread:$0]  %s982_s16, 4096, %s1500_s5, [#allocation7], %s1304_s18, %s1304_s18, %s1305_s19  }
 0x204   :  { %1296 = dma.done.wait [#allocation7], 4096  }
 0x205   :  { %1297 = vsyncadd [#allocation7], 4294963200 }
 0x206   :  { %991 = vsyncpa [#allocation6], 1 }
 0x207   :  { %992 = vsyncpa [#allocation7], 1 }

</bundles_post_ra>
